<compile_context>
chip_gen: v7x
topology: tpu7x:2x2x1
jax: 0.10.0
libtpu: 0.0.40
codegen_flags: <defaults>
</compile_context>

<pallas_src>
import math

import numpy as np
import jax
import jax.numpy as jnp
from jax.experimental import pallas as pl
from jax.experimental.pallas import tpu as pltpu


# ----------------------------- frequency index tables -----------------------------
def get_freq_indices(method):
    assert method in ['top1', 'top2', 'top4', 'top8', 'top16', 'top32', 'box16',
                      'bot1', 'bot2', 'bot4', 'bot8', 'bot16', 'bot32',
                      'low1', 'low2', 'low4', 'low8', 'low16', 'low32']
    num_freq = int(method[3:])
    if 'top' in method:
        all_x = [0, 0, 6, 0, 0, 1, 1, 4, 5, 1, 3, 0, 0, 0, 3, 2, 4, 6, 3, 5, 5, 2, 6, 5, 5, 3, 3, 4, 2, 2, 6, 1]
        all_y = [0, 1, 0, 5, 2, 0, 2, 0, 0, 6, 0, 4, 6, 3, 5, 2, 6, 3, 3, 3, 5, 1, 1, 2, 4, 2, 1, 1, 3, 0, 5, 3]
    elif 'low' in method:
        all_x = [0, 0, 1, 1, 0, 2, 2, 1, 2, 0, 3, 4, 0, 1, 3, 0, 1, 2, 3, 4, 5, 0, 1, 2, 3, 4, 5, 6, 1, 2, 3, 4]
        all_y = [0, 1, 0, 1, 2, 0, 1, 2, 2, 3, 0, 0, 4, 3, 1, 5, 4, 3, 2, 1, 0, 6, 5, 4, 3, 2, 1, 0, 6, 5, 4, 3]
    elif 'bot' in method:
        all_x = [6, 1, 3, 3, 2, 4, 1, 2, 4, 4, 5, 1, 4, 6, 2, 5, 6, 1, 6, 2, 2, 4, 3, 3, 5, 5, 6, 2, 5, 5, 3, 6]
        all_y = [6, 4, 4, 6, 6, 3, 1, 4, 4, 5, 6, 5, 2, 2, 5, 1, 4, 3, 5, 0, 3, 1, 1, 2, 4, 2, 1, 1, 5, 3, 3, 3]
    elif 'box' in method:
        all_x = [0, 1, 2, 3, 2, 3, 4, 5, 4, 3, 4, 5, 5, 4, 5, 5]
        all_y = [0, 0, 0, 0, 1, 1, 0, 0, 1, 2, 2, 1, 2, 3, 3, 4]
    else:
        raise NotImplementedError
    return all_x[:num_freq], all_y[:num_freq]


# ----------------------------- DCT filter construction (plain numpy) ---------------
def build_filter(pos, freq, POS):
    r = np.cos(np.pi * freq * (pos + 0.5) / POS) / math.sqrt(POS)
    if freq == 0:
        return r
    return r * math.sqrt(2)


def get_dct_filter(tile_x, tile_y, mapper_x, mapper_y, channel):
    dct_filter = np.zeros((channel, tile_x, tile_y), dtype=np.float32)
    c_part = channel // len(mapper_x)
    tx = np.arange(tile_x, dtype=np.float64)
    ty = np.arange(tile_y, dtype=np.float64)
    for i, (u_x, v_y) in enumerate(zip(mapper_x, mapper_y)):
        fx = build_filter(tx, u_x, tile_x)
        fy = build_filter(ty, v_y, tile_y)
        dct_filter[i * c_part:(i + 1) * c_part] = (fx[:, None] * fy[None, :]).astype(np.float32)
    return dct_filter


# ----------------------------- Pallas kernel -----------------------------
def fca_kernel(x_ref, dctw_ref, w1t_ref, w2t_ref, o_ref):
    """Fused DCT channel attention for a block of `nb` images.

    x_ref:    (nb, C, HW)  input images (flattened spatial on lanes)
    dctw_ref: (C,  HW)     DCT filter bank (adaptive pooling pre-folded), f32
    w1t_ref:  (C,  C//r)   first Linear weight, pre-transposed
    w2t_ref:  (C//r, C)    second Linear weight, pre-transposed
    o_ref:    (nb, C, HW)  rescaled output
    """
    xf = x_ref[...].astype(jnp.float32)                               # (nb, C, HW)

    # Batched DCT-weighted spatial reduction (lane reduce) -> (nb, C).
    y = jnp.sum(xf * dctw_ref[...][None], axis=-1)                    # (nb, C)

    # Squeeze/excite MLP, batched over the nb images (two tiny MXU matmuls).
    h = jnp.maximum(
        jnp.dot(y, w1t_ref[...], preferred_element_type=jnp.float32), 0.0)   # (nb, C//r)
    s = jax.nn.sigmoid(
        jnp.dot(h, w2t_ref[...], preferred_element_type=jnp.float32))        # (nb, C)

    # Per-channel rescale; s broadcasts along the lane (spatial) axis.
    o_ref[...] = (xf * s[:, :, None]).astype(o_ref.dtype)


# ----------------------------- sizing policy -----------------------------
def _vmem_capacity_bytes():
    try:
        info = pltpu.get_tpu_info()
        cap = getattr(info, "vmem_capacity_bytes", None)
        if cap:
            return int(cap)
    except Exception:
        pass
    return 64 * (1 << 20)   # conservative (v7x-class) default


def _pick_batch_block(n, c, hw, in_itemsize, const_resident_bytes, vmem_cap):
    """Images per grid step.

    Per-step pipeline footprint ~= 2*in_block + 2*out_block + one f32 compute
    temp.  v7x-class parts (<=64 MiB VMEM, 2 TCs) get a ~40 MiB pipeline
    budget and >=4 grid steps so megacore sharding keeps both cores busy;
    v5e/v6e (128 MiB, 1 TC) get ~80 MiB (=> ~16 MiB x blocks) and only need
    >=2 steps for DMA overlap.
    """
    small_vmem = vmem_cap <= 80 * (1 << 20)
    pipeline_budget = (40 if small_vmem else 80) * (1 << 20)
    min_steps = 4 if small_vmem else 2
    per_image_cost = 4 * c * hw * in_itemsize + 4 * c * hw   # 2*in + 2*out + f32 temp
    avail = max(per_image_cost, pipeline_budget - const_resident_bytes)
    nb = max(1, min(n, avail // per_image_cost))
    if n > 1:
        nb = min(nb, max(1, n // min_steps))
    return int(nb), int(per_image_cost)


# ----------------------------- wrapper -----------------------------
def prepare_fca_params(dct_weight, w1, w2, h, w, dct_h, dct_w):
    """One-time (per spatial size) constant preparation, hoisted out of the
    per-forward path: pool-folded flattened DCT filter + pre-transposed SE
    weights."""
    c = dct_weight.shape[0]
    if (h, w) != (dct_h, dct_w):
        # Fold adaptive_avg_pool2d into the DCT filters (exact for even bins):
        # pooling + DCT-weighted sum == full-resolution weighted sum against
        # bin-expanded filters scaled by 1/bin_size.
        # TODO(synk): general (uneven-bin) adaptive pooling path.
        assert h % dct_h == 0 and w % dct_w == 0
        fh, fw = h // dct_h, w // dct_w
        dctw_full = jnp.repeat(jnp.repeat(dct_weight, fh, axis=1), fw, axis=2)
        dctw_full = dctw_full / float(fh * fw)
    else:
        dctw_full = dct_weight
    dctw_flat = dctw_full.reshape(c, h * w).astype(jnp.float32)
    w1t = jnp.asarray(w1.T, dtype=jnp.float32)   # (C, C//r)
    w2t = jnp.asarray(w2.T, dtype=jnp.float32)   # (C//r, C)
    return dctw_flat, w1t, w2t


def _build_call(n, c, hw, cr, nb, out_dtype, cparams, cost, single_buffer_consts):
    def const_spec(shape):
        if single_buffer_consts:
            return pl.BlockSpec(shape, lambda i: (0,) * len(shape),
                                pipeline_mode=pl.Buffered(1))
        return pl.BlockSpec(shape, lambda i: (0,) * len(shape))

    grid = (pl.cdiv(n, nb),)
    return pl.pallas_call(
        fca_kernel,
        out_shape=jax.ShapeDtypeStruct((n, c, hw), out_dtype),
        grid_spec=pltpu.PrefetchScalarGridSpec(
            num_scalar_prefetch=0,
            grid=grid,
            in_specs=[
                pl.BlockSpec((nb, c, hw), lambda i: (i, 0, 0)),   # x
                const_spec((c, hw)),                              # DCT filter bank
                const_spec((c, cr)),                              # w1^T
                const_spec((cr, c)),                              # w2^T
            ],
            out_specs=pl.BlockSpec((nb, c, hw), lambda i: (i, 0, 0)),
        ),
        compiler_params=pltpu.CompilerParams(**cparams),
        cost_estimate=cost,
    )


def fca_forward(x, dctw_flat, w1t, w2t):
    n, c, h, w = x.shape
    hw = h * w
    assert dctw_flat.shape == (c, hw)
    cr = w1t.shape[1]

    # (N,C,H,W) -> (N,C,HW): trailing-dim collapse, no copy.  No spatial
    # padding — the last two block dims equal the full array dims, so the
    # (8,128) rule does not apply and tail lane tiles use masked stores.
    x_flat = x.reshape(n, c, hw)
    itemsize = jnp.dtype(x.dtype).itemsize

    vmem_cap = _vmem_capacity_bytes()
    dctw_bytes = c * hw * 4
    wmlp_bytes = 2 * c * cr * 4
    # conservative: assume double-buffered constants when budgeting nb
    const_resident = 2 * dctw_bytes + 2 * wmlp_bytes
    nb, per_image_cost = _pick_batch_block(n, c, hw, itemsize, const_resident, vmem_cap)

    cparams = {"dimension_semantics": ("parallel",)}
    est_vmem = nb * per_image_cost + const_resident
    if est_vmem > 10 * (1 << 20):
        # Size the scoped limit from the actual footprint (+headroom); cap at
        # ~3/4 of physical VMEM (v7x: ~48 MiB of 64; v5e/v6e: ~96 of 128).
        # TODO(synk): spatial-tiling fallback for single images whose block
        # exceeds the per-generation VMEM cap.
        cparams["vmem_limit_bytes"] = int(min(est_vmem + 4 * (1 << 20),
                                              (3 * vmem_cap) // 4))

    io_bytes = 2 * n * c * hw * itemsize + dctw_bytes + wmlp_bytes
    cost = pl.CostEstimate(
        flops=int(3 * n * c * hw + 4 * n * c * cr),
        transcendentals=int(n * c),
        bytes_accessed=int(io_bytes),
    )

    args = (x_flat, dctw_flat, w1t, w2t)
    try:
        out_flat = _build_call(n, c, hw, cr, nb, x.dtype, cparams, cost, True)(*args)
    except Exception:
        # TODO(synk): some Pallas versions reject single-buffered (Buffered(1))
        # grid-invariant operands; fall back to default double-buffering.
        out_flat = _build_call(n, c, hw, cr, nb, x.dtype, cparams, cost, False)(*args)

    return out_flat.reshape(n, c, h, w)


# ----------------------------- reference (pure JAX) -----------------------------
def fca_reference(x, dct_weight, w1, w2, dct_h, dct_w):
    n, c, h, w = x.shape
    xp = x
    if (h, w) != (dct_h, dct_w):
        xp = x.reshape(n, c, dct_h, h // dct_h, dct_w, w // dct_w).mean(axis=(3, 5))
    y = jnp.sum(xp * dct_weight[None], axis=(2, 3))              # (N, C)
    hdn = jax.nn.relu(y @ w1.T)                                  # (N, C//r)
    s = jax.nn.sigmoid(hdn @ w2.T)                               # (N, C)
    return x * s[:, :, None, None]


# ----------------------------- main -----------------------------
if __name__ == "__main__":
    # module config
    channel = 64
    dct_h = dct_w = 16
    reduction = 16
    freq_sel_method = 'top16'

    # FCALayer.__init__ equivalent
    mapper_x, mapper_y = get_freq_indices(freq_sel_method)
    mapper_x = [mx * (dct_h // 7) for mx in mapper_x]
    mapper_y = [my * (dct_w // 7) for my in mapper_y]
    dct_weight = jnp.asarray(get_dct_filter(dct_h, dct_w, mapper_x, mapper_y, channel))

    # deterministic Linear weights: w1 (C//r, C), w2 (C, C//r), both bias-free
    key = jax.random.PRNGKey(0)
    kx1, kx2, k1, k2 = jax.random.split(key, 4)
    bound1 = 1.0 / math.sqrt(channel)
    bound2 = 1.0 / math.sqrt(channel // reduction)
    w1 = jax.random.uniform(k1, (channel // reduction, channel),
                            minval=-bound1, maxval=bound1, dtype=jnp.float32)
    w2 = jax.random.uniform(k2, (channel, channel // reduction),
                            minval=-bound2, maxval=bound2, dtype=jnp.float32)

    # case 1: spatial matches the DCT size (no pooling)
    x1 = jax.random.normal(kx1, (2, channel, 16, 16), dtype=jnp.float32)
    params16 = prepare_fca_params(dct_weight, w1, w2, 16, 16, dct_h, dct_w)
    out1 = jax.block_until_ready(fca_forward(x1, *params16))
    ref1 = fca_reference(x1, dct_weight, w1, w2, dct_h, dct_w)
    assert out1.shape == x1.shape
    np.testing.assert_allclose(np.asarray(out1), np.asarray(ref1), rtol=2e-5, atol=2e-5)

    # case 2: larger spatial — adaptive avg-pool folded into the DCT filters
    x2 = jax.random.normal(kx2, (2, channel, 32, 32), dtype=jnp.float32)
    params32 = prepare_fca_params(dct_weight, w1, w2, 32, 32, dct_h, dct_w)
    out2 = jax.block_until_ready(fca_forward(x2, *params32))
    ref2 = fca_reference(x2, dct_weight, w1, w2, dct_h, dct_w)
    assert out2.shape == x2.shape
    np.testing.assert_allclose(np.asarray(out2), np.asarray(ref2), rtol=2e-5, atol=2e-5)

    print("KERNEL_OK")
</pallas_src>

<mosaic_0001>
module attributes {stable_mosaic.version = 11 : i64} {
  func.func @fca_kernel(%arg0: i32, %arg1: memref<1x64x256xf32, #tpu.memory_space<vmem>>, %arg2: memref<64x256xf32, #tpu.memory_space<vmem>>, %arg3: memref<64x4xf32, #tpu.memory_space<vmem>>, %arg4: memref<4x64xf32, #tpu.memory_space<vmem>>, %arg5: memref<1x64x256xf32, #tpu.memory_space<vmem>>) attributes {dimension_semantics = [#tpu.dimension_semantics<parallel>], iteration_bounds = array<i64: 2>, scalar_prefetch = 0 : i64, scratch_operands = 0 : i64, tpu.core_type = #tpu.core_type<tc>, window_params = [{transform_indices = @transform_0, window_bounds = array<i64: 1, 64, 256>}, {pipeline_mode = #tpu.pipeline_mode<synchronous>, transform_indices = @transform_1, window_bounds = array<i64: 64, 256>}, {pipeline_mode = #tpu.pipeline_mode<synchronous>, transform_indices = @transform_2, window_bounds = array<i64: 64, 4>}, {pipeline_mode = #tpu.pipeline_mode<synchronous>, transform_indices = @transform_3, window_bounds = array<i64: 4, 64>}, {transform_indices = @transform_4, window_bounds = array<i64: 1, 64, 256>}]} {
    %c0 = arith.constant 0 : index
    %c0_0 = arith.constant 0 : index
    %c0_1 = arith.constant 0 : index
    %0 = vector.load %arg1[%c0, %c0_0, %c0_1] : memref<1x64x256xf32, #tpu.memory_space<vmem>>, vector<1x64x256xf32>
    %c0_2 = arith.constant 0 : index
    %c0_3 = arith.constant 0 : index
    %1 = vector.load %arg2[%c0_2, %c0_3] : memref<64x256xf32, #tpu.memory_space<vmem>>, vector<64x256xf32>
    %2 = vector.shape_cast %1 : vector<64x256xf32> to vector<1x64x256xf32>
    %3 = arith.mulf %0, %2 : vector<1x64x256xf32>
    %cst = arith.constant dense<0.000000e+00> : vector<1x64xf32>
    %4 = vector.multi_reduction <add>, %3, %cst [2] : vector<1x64x256xf32> to vector<1x64xf32>
    %c0_4 = arith.constant 0 : index
    %c0_5 = arith.constant 0 : index
    %5 = vector.load %arg3[%c0_4, %c0_5] : memref<64x4xf32, #tpu.memory_space<vmem>>, vector<64x4xf32>
    %cst_6 = arith.constant dense<0.000000e+00> : vector<1x4xf32>
    %6 = tpu.matmul %4, %5, %cst_6 {dimension_numbers = #tpu.dot_dimension_numbers<[1], [0], [0], [1], [0, 0, 1, 1], [], []>} : vector<1x64xf32>, vector<64x4xf32>, vector<1x4xf32> -> vector<1x4xf32>
    %cst_7 = arith.constant 0.000000e+00 : f32
    %7 = vector.broadcast %cst_7 : f32 to vector<1x4xf32>
    %8 = arith.maximumf %6, %7 : vector<1x4xf32>
    %c0_8 = arith.constant 0 : index
    %c0_9 = arith.constant 0 : index
    %9 = vector.load %arg4[%c0_8, %c0_9] : memref<4x64xf32, #tpu.memory_space<vmem>>, vector<4x64xf32>
    %cst_10 = arith.constant dense<0.000000e+00> : vector<1x64xf32>
    %10 = tpu.matmul %8, %9, %cst_10 {dimension_numbers = #tpu.dot_dimension_numbers<[1], [0], [0], [1], [0, 0, 1, 1], [], []>} : vector<1x4xf32>, vector<4x64xf32>, vector<1x64xf32> -> vector<1x64xf32>
    %11 = arith.negf %10 : vector<1x64xf32>
    %12 = math.exp %11 : vector<1x64xf32>
    %cst_11 = arith.constant 1.000000e+00 : f32
    %13 = vector.broadcast %cst_11 : f32 to vector<1x64xf32>
    %14 = arith.addf %13, %12 : vector<1x64xf32>
    %15 = arith.divf %13, %14 : vector<1x64xf32>
    %16 = vector.shape_cast %15 : vector<1x64xf32> to vector<1x64x1xf32>
    %17 = vector.broadcast %16 : vector<1x64x1xf32> to vector<1x64x256xf32>
    %18 = arith.mulf %0, %17 : vector<1x64x256xf32>
    %c0_12 = arith.constant 0 : index
    %c0_13 = arith.constant 0 : index
    %c0_14 = arith.constant 0 : index
    %19 = vector.load %arg5[%c0_12, %c0_13, %c0_14] : memref<1x64x256xf32, #tpu.memory_space<vmem>>, vector<1x64x256xf32>
    tpu.vector_store %arg5[%c0_12, %c0_13, %c0_14], %18 {strides = array<i32>} : memref<1x64x256xf32, #tpu.memory_space<vmem>>, vector<1x64x256xf32>,
    return
  }
  func.func @transform_0(%arg0: i32) -> (i32, i32, i32) {
    %c0_i32 = arith.constant 0 : i32
    %c0_i32_0 = arith.constant 0 : i32
    %c0_i32_1 = arith.constant 0 : i32
    return %arg0, %c0_i32, %c0_i32_0 : i32, i32, i32
  }
  func.func @transform_1(%arg0: i32) -> (i32, i32) {
    %c0_i32 = arith.constant 0 : i32
    %c0_i32_0 = arith.constant 0 : i32
    %c0_i32_1 = arith.constant 0 : i32
    return %c0_i32, %c0_i32_0 : i32, i32
  }
  func.func @transform_2(%arg0: i32) -> (i32, i32) {
    %c0_i32 = arith.constant 0 : i32
    %c0_i32_0 = arith.constant 0 : i32
    %c0_i32_1 = arith.constant 0 : i32
    return %c0_i32, %c0_i32_0 : i32, i32
  }
  func.func @transform_3(%arg0: i32) -> (i32, i32) {
    %c0_i32 = arith.constant 0 : i32
    %c0_i32_0 = arith.constant 0 : i32
    %c0_i32_1 = arith.constant 0 : i32
    return %c0_i32, %c0_i32_0 : i32, i32
  }
  func.func @transform_4(%arg0: i32) -> (i32, i32, i32) {
    %c0_i32 = arith.constant 0 : i32
    %c0_i32_0 = arith.constant 0 : i32
    %c0_i32_1 = arith.constant 0 : i32
    return %arg0, %c0_i32, %c0_i32_0 : i32, i32, i32
  }
}

module attributes {stable_mosaic.version = 11 : i64} {
  func.func @fca_kernel(%arg0: i32, %arg1: memref<1x64x256xf32, #tpu.memory_space<vmem>>, %arg2: memref<64x256xf32, #tpu.memory_space<vmem>>, %arg3: memref<64x4xf32, #tpu.memory_space<vmem>>, %arg4: memref<4x64xf32, #tpu.memory_space<vmem>>, %arg5: memref<1x64x256xf32, #tpu.memory_space<vmem>>) attributes {dimension_semantics = [#tpu.dimension_semantics<parallel>], iteration_bounds = array<i64: 2>, scalar_prefetch = 0 : i64, scratch_operands = 0 : i64, tpu.core_type = #tpu.core_type<tc>, window_params = [{transform_indices = @transform_0, window_bounds = array<i64: 1, 64, 256>}, {pipeline_mode = #tpu.pipeline_mode<synchronous>, transform_indices = @transform_1, window_bounds = array<i64: 64, 256>}, {pipeline_mode = #tpu.pipeline_mode<synchronous>, transform_indices = @transform_2, window_bounds = array<i64: 64, 4>}, {pipeline_mode = #tpu.pipeline_mode<synchronous>, transform_indices = @transform_3, window_bounds = array<i64: 4, 64>}, {transform_indices = @transform_4, window_bounds = array<i64: 1, 64, 256>}]} {
    %c0 = arith.constant 0 : index
    %c0_0 = arith.constant 0 : index
    %c0_1 = arith.constant 0 : index
    %0 = vector.load %arg1[%c0, %c0_0, %c0_1] : memref<1x64x256xf32, #tpu.memory_space<vmem>>, vector<1x64x256xf32>
    %c0_2 = arith.constant 0 : index
    %c0_3 = arith.constant 0 : index
    %1 = vector.load %arg2[%c0_2, %c0_3] : memref<64x256xf32, #tpu.memory_space<vmem>>, vector<64x256xf32>
    %2 = vector.shape_cast %1 : vector<64x256xf32> to vector<1x64x256xf32>
    %3 = arith.mulf %0, %2 : vector<1x64x256xf32>
    %cst = arith.constant dense<0.000000e+00> : vector<1x64xf32>
    %4 = vector.multi_reduction <add>, %3, %cst [2] : vector<1x64x256xf32> to vector<1x64xf32>
    %c0_4 = arith.constant 0 : index
    %c0_5 = arith.constant 0 : index
    %5 = vector.load %arg3[%c0_4, %c0_5] : memref<64x4xf32, #tpu.memory_space<vmem>>, vector<64x4xf32>
    %cst_6 = arith.constant dense<0.000000e+00> : vector<1x4xf32>
    %6 = tpu.matmul %4, %5, %cst_6 {dimension_numbers = #tpu.dot_dimension_numbers<[1], [0], [0], [1], [0, 0, 1, 1], [], []>} : vector<1x64xf32>, vector<64x4xf32>, vector<1x4xf32> -> vector<1x4xf32>
    %cst_7 = arith.constant 0.000000e+00 : f32
    %7 = vector.broadcast %cst_7 : f32 to vector<1x4xf32>
    %8 = arith.maximumf %6, %7 : vector<1x4xf32>
    %c0_8 = arith.constant 0 : index
    %c0_9 = arith.constant 0 : index
    %9 = vector.load %arg4[%c0_8, %c0_9] : memref<4x64xf32, #tpu.memory_space<vmem>>, vector<4x64xf32>
    %cst_10 = arith.constant dense<0.000000e+00> : vector<1x64xf32>
    %10 = tpu.matmul %8, %9, %cst_10 {dimension_numbers = #tpu.dot_dimension_numbers<[1], [0], [0], [1], [0, 0, 1, 1], [], []>} : vector<1x4xf32>, vector<4x64xf32>, vector<1x64xf32> -> vector<1x64xf32>
    %11 = arith.negf %10 : vector<1x64xf32>
    %12 = math.exp %11 : vector<1x64xf32>
    %cst_11 = arith.constant 1.000000e+00 : f32
    %13 = vector.broadcast %cst_11 : f32 to vector<1x64xf32>
    %14 = arith.addf %13, %12 : vector<1x64xf32>
    %15 = arith.divf %13, %14 : vector<1x64xf32>
    %16 = vector.shape_cast %15 : vector<1x64xf32> to vector<1x64x1xf32>
    %17 = vector.broadcast %16 : vector<1x64x1xf32> to vector<1x64x256xf32>
    %18 = arith.mulf %0, %17 : vector<1x64x256xf32>
    %c0_12 = arith.constant 0 : index
    %c0_13 = arith.constant 0 : index
    %c0_14 = arith.constant 0 : index
    %19 = vector.load %arg5[%c0_12, %c0_13, %c0_14] : memref<1x64x256xf32, #tpu.memory_space<vmem>>, vector<1x64x256xf32>
    tpu.vector_store %arg5[%c0_12, %c0_13, %c0_14], %18 {strides = array<i32>} : memref<1x64x256xf32, #tpu.memory_space<vmem>>, vector<1x64x256xf32>,
    return
  }
  func.func @transform_0(%arg0: i32) -> (i32, i32, i32) {
    %c0_i32 = arith.constant 0 : i32
    %c0_i32_0 = arith.constant 0 : i32
    %c0_i32_1 = arith.constant 0 : i32
    return %arg0, %c0_i32, %c0_i32_0 : i32, i32, i32
  }
  func.func @transform_1(%arg0: i32) -> (i32, i32) {
    %c0_i32 = arith.constant 0 : i32
    %c0_i32_0 = arith.constant 0 : i32
    %c0_i32_1 = arith.constant 0 : i32
    return %c0_i32, %c0_i32_0 : i32, i32
  }
  func.func @transform_2(%arg0: i32) -> (i32, i32) {
    %c0_i32 = arith.constant 0 : i32
    %c0_i32_0 = arith.constant 0 : i32
    %c0_i32_1 = arith.constant 0 : i32
    return %c0_i32, %c0_i32_0 : i32, i32
  }
  func.func @transform_3(%arg0: i32) -> (i32, i32) {
    %c0_i32 = arith.constant 0 : i32
    %c0_i32_0 = arith.constant 0 : i32
    %c0_i32_1 = arith.constant 0 : i32
    return %c0_i32, %c0_i32_0 : i32, i32
  }
  func.func @transform_4(%arg0: i32) -> (i32, i32, i32) {
    %c0_i32 = arith.constant 0 : i32
    %c0_i32_0 = arith.constant 0 : i32
    %c0_i32_1 = arith.constant 0 : i32
    return %arg0, %c0_i32, %c0_i32_0 : i32, i32, i32
  }
}

</mosaic_0001>

<bundles_post_ra>
// kernel: tpu_custom_call.1
= control target key start
LH: loop header
LB: loop body
LE: loop exit
PB: predicated region body
PF: predicated region fallthrough
CT: control target
= control target key end

     0   :  { %9 = vsyncpa [#allocation3], 0  ;;  %s1349_s0 = inlined_call_operand.hbm [shape: f32[2,64,256], index: 0, kind: input, shape index: {}]   ;;  %s1350_s1 = inlined_call_operand.hbm [shape: f32[64,256], index: 1, kind: input, shape index: {}]   ;;  %s1351_s2 = inlined_call_operand.vmem [shape: f32[64,4], index: 2, kind: input, shape index: {}]   ;;  %s1352_s3 = inlined_call_operand.vmem [shape: f32[4,64], index: 3, kind: input, shape index: {}]   ;;  %s1353_s4 = inlined_call_operand.hbm [shape: f32[2,64,256], index: 4, kind: output, shape index: {}]  }
   0x1   :  { %11 = vsyncpa [#allocation3 + $0x1], 0 }
   0x2   :  { %12 = vsyncpa [#allocation6], 0 }
   0x3   :  { %13 = vsyncpa [#allocation4], 0 }
   0x4   :  { %15 = vsyncpa [#allocation4 + $0x1], 0  ;;  %s999_s15 = smov 0   ;;  %s1001_s16 = smov 0  }
   0x5   :  { %s1003_s17 = smov 0   ;;  %s1005_s18 = smov 0  }
   0x6 LB: > { %s1020_s19 = sadd.s32 4294967295, %s962_s18   ;;  %s697_s20 = sadd.s32 4294967294, %s962_s18   ;;  %s962_s18 = sphi %s1005_s18, %s1373_s18   ;;  %s958_s17 = sphi %s1003_s17, %s1372_s17   ;;  %s954_s16 = sphi %s1001_s16, %s1371_s16   ;;  %s950_s15 = sphi %s999_s15, %s1370_s15  }
   0x7   : > { %p41_p0 = scmp.ne.s32.totalorder %s954_s16, %s950_s15  ;;  %p1354_p1 = scmp.eq.s32.totalorder %s1020_s19, 0 }
   0x8   : > { %p134_p3 = scmp.eq.s32.totalorder %s697_s20, 1  ;;  %p698_p5 = scmp.ge.s32.totalorder %s962_s18, 1 }
   0x9   : > { %p1029_p4 = por %p1354_p1, %p41_p0  ;;  %p141_p7 = scmp.lt.s32.totalorder %s962_s18, 3 }
   0xa   : > { %p1034_p6 = por %p134_p3, %p41_p0  ;;  %s964_s24 = smov [#allocation5]  }
   0xb   : > { %s1357_s21 = scalar_select %p1029_p4, 1, 0 }
   0xc   : > { %s1358_s22 = scalar_select %p1034_p6, 1, 0 }
   0xd   : > { %p1039_p8 = pnand %p698_p5, %p141_p7  ;;  %s153_s25 = sshll.u32 %s964_s24, 4  ;;  %s1043_s25 = int_to_ptr.vmem [resolvable:$true] %s153_s25 }
   0xe   : > { %s1055_s27 = sadd.s32 1, %s962_s18   ;;  %s28_s28 = sadd.s32 1, %s958_s17 }
   0xf   : > { %s1359_s23 = scalar_select %p1039_p8, 1, 0 }
  0x10   : > { %p774_p9 = pneg %p1039_p8  ;;  %s25_s29 = ssub.s32 %s962_s18, %s1055_s27 }
  0x11   : > { %s834_s6 = scalar_lea.hbm %s1350_s1, 2048 }
  0x12   : > { %p1050_p11 = pnand %p774_p9, %p1354_p1  ;;  %p835_p12 = scmp.ne.s32.totalorder %s1350_s1, %s834_s6 }
  0x13   : > { %p841_p5 = scmp.lt.u32.totalorder %s834_s6, %s1350_s1 }
  0x14   : > { %p836_p13 = pneg %p1050_p11 }
  0x16   : > { %p837_p0 = pnand %p836_p13, %p835_p12 }
  0x18   : > { %p838_p3 = pneg %p837_p0 }
  0x1a   : > { %p843_p7 = pnand %p841_p5, %p838_p3 }
  0x1c   : > { %846 = shalt.err (!%p843_p7)
}
  0x1d   : > { %s847_s11 = scalar_lea.vmem %s1043_s25, 2048  ;;  %p855_p2 = scmp.lt.s32.totalorder %s1043_s25, %s1043_s25 }
  0x1e   : > { %p848_p9 = scmp.ne.s32.totalorder %s1043_s25, %s847_s11  ;;  %p856_p6 = scmp.lt.s32.totalorder %s847_s11, %s847_s11 }
  0x20   : > { %p850_p10 = pnand %p848_p9, %p836_p13  ;;  %p857_p4 = por %p856_p6, %p855_p2 }
  0x22   : > { %p851_p1 = pneg %p850_p10 }
  0x24   : > { %p858_p8 = pnand %p857_p4, %p851_p1 }
  0x26   : > { %861 = shalt.err (!%p858_p8)
}
  0x27   : > { %s965_s12 = smov 256   ;;  %s966_s13 = smov 16  }
  0x28   : > { %777 = dma.hbm_to_vmem [thread:$0]  (!%p1050_p11), %s1350_s1, 2048, %s1043_s25, [#allocation6], %s965_s12, %s965_s12, %s966_s13  }
  0x29   : > { %p26_p1 = scmp.eq.s32.totalorder %s25_s29, 0  ;;  %p35_p2 = scmp.ne.s32.totalorder %s958_s17, %s954_s16 }
  0x2a   : > { %p36_p4 = scmp.eq.s32.totalorder %s962_s18, 0  ;;  %p787_p6 = scmp.lt.s32.totalorder %s962_s18, 2 }
  0x2b   : > { %s1089_s24 = scalar_select %p26_p1, %s958_s17, %s28_s28  }
  0x2c   : > { %p37_p8 = por %p36_p4, %p35_p2  ;;  %p1361_p10 = scmp.eq.s32.totalorder %s1020_s19, 1 }
  0x2d   : > { %s173_s26 = sand.u32 1, %s958_s17   ;;  %s717_s5 = sshll.u32 %s962_s18, 11 }
  0x2e   : > { %p1093_p12 = por %p1361_p10, %p35_p2  ;;  %s701_s6 = sshll.u32 %s173_s26, 7 }
  0x2f   : > { %s1102_s9 = scalar_lea.hbm %s1349_s0, %s717_s5  ;;  %s177_s25 = scalar_lea.vmem [#allocation2], %s701_s6 }
  0x30   : > { %s184_s28 = sshll.u32 %s177_s25, 4  ;;  %p1104_p11 = pnand %p787_p6, %p37_p8  ;;  %s1108_s28 = int_to_ptr.vmem [resolvable:$true] %s184_s28 }
  0x31   : > { %s1110_s10 = scalar_lea.sflag [#allocation3], %s173_s26  ;;  %s862_s11 = scalar_lea.hbm %s1102_s9, 2048 }
  0x32   : > { %p863_p13 = scmp.ne.s32.totalorder %s1102_s9, %s862_s11  ;;  %p864_p0 = pneg %p1104_p11 }
  0x33   : > { %s867_s5 = scalar_lea.hbm %s1349_s0, 4096  ;;  %p868_p7 = scmp.lt.u32.totalorder %s1102_s9, %s1349_s0 }
  0x34   : > { %p865_p3 = pnand %p864_p0, %p863_p13  ;;  %p869_p9 = scmp.lt.u32.totalorder %s867_s5, %s862_s11 }
  0x35   : > { %p871_p2 = scmp.lt.u32.totalorder %s862_s11, %s1102_s9 }
  0x36   : > { %p866_p5 = pneg %p865_p3  ;;  %p870_p1 = por %p869_p9, %p868_p7 }
  0x38   : > { %p872_p4 = por %p871_p2, %p870_p1 }
  0x3a   : > { %p873_p6 = pnand %p872_p4, %p866_p5 }
  0x3c   : > { %876 = shalt.err (!%p873_p6)
}
  0x3d   : > { %s877_s26 = scalar_lea.vmem %s1108_s28, 2048  ;;  %s967_s8 = smov [#allocation2]  }
  0x3e   : > { %p878_p8 = scmp.ne.s32.totalorder %s1108_s28, %s877_s26  ;;  %s882_s25 = sshll.u32 %s967_s8, 4  ;;  %s883_s25 = int_to_ptr.vmem [resolvable:$false] %s882_s25 }
  0x3f   : > { %s884_s14 = scalar_lea.vmem %s883_s25, 4096  ;;  %p885_p3 = scmp.lt.s32.totalorder %s1108_s28, %s883_s25 }
  0x40   : > { %p880_p10 = pnand %p878_p8, %p864_p0  ;;  %p886_p7 = scmp.lt.s32.totalorder %s884_s14, %s877_s26 }
  0x42   : > { %p881_p13 = pneg %p880_p10  ;;  %p887_p9 = por %p886_p7, %p885_p3 }
  0x44   : > { %p888_p1 = pnand %p887_p9, %p881_p13 }
  0x46   : > { %891 = shalt.err (!%p888_p1)
}
  0x47   : > { %781 = dma.hbm_to_vmem [thread:$0]  (!%p1104_p11), %s1102_s9, 2048, %s1108_s28, %s1110_s10, %s965_s12, %s965_s12, %s966_s13  }
  0x48   : > { %p1364_p0 = scmp.ne.s32.totalorder %s1359_s23, 0 }
  0x49   : > { %s1144_s11 = sand.u32 (!%p1364_p0), 1, %s954_s16   ;;  %p1365_p5 = scmp.ne.s32.totalorder (!%p1364_p0), %s1357_s21, 0 }
  0x4a   : > { %196 = sbr.rel (%p1364_p0) target bundleno = 852 (0x354), region = 36  ;;  %s705_s20 = sshll.u32 (!%p1364_p0), %s1144_s11, 7 }
  0x4b   : > { %s199_s5 = scalar_lea.sflag (!%p1364_p0), [#allocation3], %s1144_s11  ;;  %s1150_s29 = scalar_lea.vmem (!%p1364_p0), [#allocation2], %s705_s20 }
  0x51   : > { %937 = dma.done.wait (%p1365_p5), %s199_s5, 2048  }
  0x52   : > { %939 = vsyncadd (%p1365_p5), %s199_s5, 4294965248  ;;  %p1366_p11 = scmp.eq.s32.totalorder %s1020_s19, 0 }
  0x54   : > { %941 = dma.done.wait (%p1366_p11), [#allocation6], 2048   ;;  %p1367_p2 = pmov %p1366_p11 }
  0x55   : > { %v1161_v0 = vld [vmem:[%s1150_s29] sm:$0xff]  ;;  %v1164_v1 = vld [vmem:[%s1150_s29 + $0x8] sm:$0xff]  ;;  %v1175_v10 = vld [vmem:[%s1150_s29 + $0x10] sm:$0xff]  ;;  %v968_v59 = vmov 0.0|0.0   ;;  %vm969_vm0 = vmmov 0   ;;  %vm330_vm1 = vcmask 130112  }
  0x56   : > { %943 = vsyncadd (%p1367_p2), [#allocation6], 4294965248  ;;  %v247_v2 = vld [vmem:[#allocation5] sm:$0xff]  ;;  %v248_v3 = vld [vmem:[#allocation5 + $0x8] sm:$0xff]  ;;  %754 = vmatprep.subr.bf16.mxu0 %v968_v59  ;;  %vm337_vm2 = vcmask 195712   ;;  %vm344_vm3 = vcmask 261312  }
  0x57   : > { %v263_v4 = vmul.f32 %v247_v2, %v1161_v0  ;;  %v1168_v5 = vld [vmem:[%s1150_s29 + $0x20] sm:$0xff]  ;;  %v1171_v6 = vld [vmem:[%s1150_s29 + $0x28] sm:$0xff]  ;;  %v264_v7 = vmul.f32 %v248_v3, %v1164_v1  ;;  %v1180_v13 = vld [vmem:[%s1150_s29 + $0x18] sm:$0xff]  ;;  %vm351_vm4 = vcmask 326912   ;;  %vm358_vm5 = vcmask 392512   ;;  %s1268_s13 = scalar_lea.vmem [#allocation7], %s705_s20 }
  0x58   : > { %v251_v8 = vld [vmem:[#allocation5 + $0x20] sm:$0xff]  ;;  %v252_v9 = vld [vmem:[#allocation5 + $0x28] sm:$0xff]  ;;  %v249_v14 = vld [vmem:[#allocation5 + $0x10] sm:$0xff]  ;;  %vm365_vm6 = vcmask 458112   ;;  %vm372_vm7 = vcmask 523712   ;;  %vm374_vm8 = vcmask 523264  }
  0x59   : > { %v267_v11 = vmul.f32 %v251_v8, %v1168_v5  ;;  %v268_v12 = vmul.f32 %v252_v9, %v1171_v6  ;;  %v250_v15 = vld [vmem:[#allocation5 + $0x18] sm:$0xff]  ;;  %v279_v16 = vadd.f32 %v264_v7, %v263_v4  ;;  %v265_v17 = vmul.f32 %v249_v14, %v1175_v10  ;;  %v1185_v19 = vld [vmem:[%s1150_s29 + $0x30] sm:$0xff]  ;;  %v1192_v25 = vld [vmem:[%s1150_s29 + $0x40] sm:$0xff]  ;;  %s718_s20 = sshll.u32 %s1020_s19, 11  ;;  %s614_s9 = sshll.u32 %s1268_s13, 4  ;;  %s1301_s9 = int_to_ptr.vmem [resolvable:$true] %s614_s9 }
  0x5a   : > { %v266_v18 = vmul.f32 %v250_v15, %v1180_v13  ;;  %v1188_v20 = vld [vmem:[%s1150_s29 + $0x38] sm:$0xff]  ;;  %v253_v21 = vld [vmem:[#allocation5 + $0x30] sm:$0xff]  ;;  %v1195_v26 = vld [vmem:[%s1150_s29 + $0x48] sm:$0xff]  ;;  %v970_v9 = vmov 0.0   ;;  %vm453_vm9 = vcmask 1043456   ;;  %vm449_vm10 = vcmask 31744   ;;  %s1299_s6 = scalar_lea.hbm %s1353_s4, %s718_s20 }
  0x5b   : > { %v285_v22 = vadd.f32 %v268_v12, %v267_v11  ;;  %v254_v23 = vld [vmem:[#allocation5 + $0x38] sm:$0xff]  ;;  %v269_v24 = vmul.f32 %v253_v21, %v1185_v19  ;;  %280 = vadd.xlane.f32.xlu0 %v279_v16  ;;  %v255_v29 = vld [vmem:[#allocation5 + $0x40] sm:$0xff]  ;;  %v256_v30 = vld [vmem:[#allocation5 + $0x48] sm:$0xff]  ;;  %746 = vmatprep.mubr.msk.f32.mxu0 %vm969_vm0, %v970_v9  ;;  %v319_v11 = vlaneseq  ;;  %s601_s19 = scalar_lea.sflag [#allocation4], %s1144_s11  ;;  %s892_s7 = scalar_lea.vmem %s1301_s9, 2048 }
  0x5c   : > { %v282_v27 = vadd.f32 %v266_v18, %v265_v17  ;;  %v270_v28 = vmul.f32 %v254_v23, %v1188_v20  ;;  %v1199_v31 = vld [vmem:[%s1150_s29 + $0x50] sm:$0xff]  ;;  %v271_v32 = vmul.f32 %v255_v29, %v1192_v25  ;;  %v272_v33 = vmul.f32 %v256_v30, %v1195_v26  ;;  %v1204_v34 = vld [vmem:[%s1150_s29 + $0x58] sm:$0xff]  ;;  %v1209_v40 = vld [vmem:[%s1150_s29 + $0x60] sm:$0xff]  ;;  %749 = vmatprep.subr.mxu1 %v970_v9  ;;  %p893_p4 = scmp.ne.s32.totalorder %s1301_s9, %s892_s7  ;;  %s971_s26 = smov [#allocation7]  }
  0x5d   : > { %286 = vadd.xlane.f32.xlu1 %v285_v22  ;;  %v257_v35 = vld [vmem:[#allocation5 + $0x50] sm:$0xff]  ;;  %v258_v36 = vld [vmem:[#allocation5 + $0x58] sm:$0xff]  ;;  %v1212_v41 = vld [vmem:[%s1150_s29 + $0x68] sm:$0xff]  ;;  %751 = vmatprep.mubr.msk.f32.mxu1 %vm969_vm0, %v970_v9  ;;  %v320_v12 = vand.u32 127, %v319_v11  ;;  %v1248_v14 = vshrl.u32 %v319_v11, 7  ;;  %s896_s8 = sshll.u32 %s971_s26, 4  ;;  %s897_s8 = int_to_ptr.vmem [resolvable:$false] %s896_s8 }
  0x5e   : > { %v288_v37 = vadd.f32 %v270_v28, %v269_v24  ;;  %v273_v38 = vmul.f32 %v257_v35, %v1199_v31  ;;  %v274_v39 = vmul.f32 %v258_v36, %v1204_v34  ;;  %v259_v42 = vld [vmem:[#allocation5 + $0x60] sm:$0xff]  ;;  %v260_v43 = vld [vmem:[#allocation5 + $0x68] sm:$0xff]  ;;  %v1215_v44 = vld [vmem:[%s1150_s29 + $0x70] sm:$0xff]  ;;  %v291_v46 = vadd.f32 %v272_v33, %v271_v32  ;;  %p894_p6 = pnand %p893_p4, %p1093_p12  ;;  %s898_s25 = scalar_lea.vmem %s897_s8, 4096 }
  0x5f   : > { %v1218_v45 = vld [vmem:[%s1150_s29 + $0x78] sm:$0xff]  ;;  %283 = vadd.xlane.f32.xlu0 %v282_v27  ;;  %v275_v47 = vmul.f32 %v259_v42, %v1209_v40  ;;  %v276_v48 = vmul.f32 %v260_v43, %v1212_v41  ;;  %v261_v49 = vld [vmem:[#allocation5 + $0x70] sm:$0xff]  ;;  %v303_v56 = vld [vmem:[%s1351_s2] sm:$0xff]  ;;  %v325_v15 = vadd.s32 4294967288, %v320_v12  ;;  %v332_v16 = vadd.s32 4294967280, %v320_v12  ;;  %p899_p10 = scmp.lt.s32.totalorder %s1301_s9, %s897_s8  ;;  %p900_p13 = scmp.lt.s32.totalorder %s898_s25, %s892_s7 }
  0x60   : > { %v262_v50 = vld [vmem:[#allocation5 + $0x78] sm:$0xff]  ;;  %v294_v51 = vadd.f32 %v274_v39, %v273_v38  ;;  %v277_v52 = vmul.f32 %v261_v49, %v1215_v44  ;;  %v304_v57 = vld [vmem:[%s1351_s2 + $0x8] sm:$0xff]  ;;  %v305_v60 = vld [vmem:[%s1351_s2 + $0x10] sm:$0xff]  ;;  %v339_v17 = vadd.s32 4294967272, %v320_v12  ;;  %v323_v21 = vsub.s32 %v320_v12, %v1248_v14  ;;  %p895_p8 = pneg %p894_p6 }
  0x61   : > { %289 = vadd.xlane.f32.xlu1 %v288_v37  ;;  %v278_v53 = vmul.f32 %v262_v50, %v1218_v45  ;;  %v297_v54 = vadd.f32 %v276_v48, %v275_v47  ;;  %v755_v58 = vpack.c.bf16 %v304_v57, %v303_v56  ;;  %v306_v61 = vld [vmem:[%s1351_s2 + $0x18] sm:$0xff]  ;;  %v307_v63 = vld [vmem:[%s1351_s2 + $0x20] sm:$0xff]  ;;  %v308_v2 = vld [vmem:[%s1351_s2 + $0x28] sm:$0xff]  ;;  %v328_v23 = vsub.s32 %v325_v15, %v1248_v14  ;;  %p901_p3 = por %p900_p13, %p899_p10 }
  0x62   : > { %v758_v62 = vpack.c.bf16 %v306_v61, %v305_v60  ;;  %v761_v3 = vpack.c.bf16 %v308_v2, %v307_v63  ;;  %v309_v4 = vld [vmem:[%s1351_s2 + $0x30] sm:$0xff]  ;;  %v310_v7 = vld [vmem:[%s1351_s2 + $0x38] sm:$0xff]  ;;  %v346_v24 = vadd.s32 4294967264, %v320_v12  ;;  %v335_v27 = vsub.s32 %v332_v16, %v1248_v14  ;;  %v448_v63 = vld [vmem:[%s1352_s3] sm:$0xf] }
  0x63   : > { %292 = vadd.xlane.f32.xlu0 %v291_v46  ;;  %v300_v55 = vadd.f32 %v278_v53, %v277_v52  ;;  %756 = vmatpush3.bf16.msra.mxu0 %v755_v58  ;;  %v764_v8 = vpack.c.bf16 %v310_v7, %v309_v4  ;;  %v342_v28 = vsub.s32 %v339_v17, %v1248_v14  ;;  %v353_v29 = vadd.s32 4294967256, %v320_v12  ;;  %p902_p7 = pnand %p901_p3, %p895_p8 }
  0x64   : > { %757 = vmatprep.subr.bf16.mxu0 %v968_v59  ;;  %v349_v36 = vsub.s32 %v346_v24, %v1248_v14  ;;  %v360_v37 = vadd.s32 4294967248, %v320_v12  ;;  %v367_v43 = vadd.s32 4294967240, %v320_v12  ;;  %750 = vmatpush3.msk.msra.mxu1 %vm453_vm9, %v448_v63  ;;  %v535_v15 = vsub.s32 0, %v1248_v14 }
  0x65   : > { %295 = vadd.xlane.f32.xlu1 %v294_v51  ;;  %v356_v42 = vsub.s32 %v353_v29, %v1248_v14 }
  0x66   : > { %v363_v52 = vsub.s32 %v360_v37, %v1248_v14 }
  0x67   : > { %298 = vadd.xlane.f32.xlu0 %v297_v54  ;;  %759 = vmatpush3.bf16.msra.mxu0 %v758_v62  ;;  %v370_v54 = vsub.s32 %v367_v43, %v1248_v14 }
  0x68   : > { %760 = vmatprep.subr.bf16.mxu0 %v968_v59 }
  0x69   : > { %301 = vadd.xlane.f32.xlu1 %v300_v55 }
  0x6b   : > { %762 = vmatpush3.bf16.msra.mxu0 %v761_v3 }
  0x6c   : > { %763 = vmatprep.subr.bf16.mxu0 %v968_v59 }
  0x6f   : > { %765 = vmatpush3.bf16.msra.mxu0 %v764_v8 }
  0xe8   : > { %v281_v18 = vpop.xlane.xlu0 %280 }
  0xe9   : > { %v324_v32 = vrot.slane %v281_v18, %v323_v21 }
  0xea   : > { %v287_v22 = vpop.xlane.xlu1 %286 }
  0xeb   : > { %v336_v38 = vrot.slane %v287_v22, %v335_v27 }
  0xec   : > { %v284_v30 = vpop.xlane.xlu0 %283 }
  0xed   : > { %v329_v33 = vrot.slane %v284_v30, %v328_v23 }
  0xee   : > { %v290_v35 = vpop.xlane.xlu1 %289 }
  0xef   : > { %v343_v39 = vrot.slane %v290_v35, %v342_v28  ;;  %v331_v46 = vsel %vm330_vm1, %v329_v33, %v324_v32 }
  0xf0   : > { %v338_v47 = vsel %vm337_vm2, %v336_v38, %v331_v46  ;;  %v293_v48 = vpop.xlane.xlu0 %292 }
  0xf1   : > { %v345_v49 = vsel %vm344_vm3, %v343_v39, %v338_v47  ;;  %v350_v50 = vrot.slane %v293_v48, %v349_v36 }
  0xf2   : > { %v296_v51 = vpop.xlane.xlu1 %295 }
  0xf3   : > { %v357_v53 = vrot.slane %v296_v51, %v356_v42  ;;  %v352_v55 = vsel %vm351_vm4, %v350_v50, %v345_v49 }
  0xf4   : > { %v299_v56 = vpop.xlane.xlu0 %298 }
  0xf5   : > { %v364_v57 = vrot.slane %v299_v56, %v363_v52  ;;  %v359_v59 = vsel %vm358_vm5, %v357_v53, %v352_v55 }
  0xf6   : > { %v302_v58 = vpop.xlane.xlu1 %301 }
  0xf7   : > { %v371_v60 = vrot.slane %v302_v58, %v370_v54  ;;  %v366_v61 = vsel %vm365_vm6, %v364_v57, %v359_v59 }
  0xf9   : > { %v373_v62 = vsel %vm372_vm7, %v371_v60, %v366_v61 }
  0xfa   : > { %747 = vmatmul.mubr.msk.f32.vlgmr.msra.gmra.mrb[0].mxu0 %vm374_vm8, %v373_v62 }
 0x1cd   : > { %v443_v2 = vpop.f32.mrb[0].mxu0 }
 0x1ce   : > { %v447_v3 = vmax.f32 %v443_v2, 0.0  ;;  %v748_v4 = vpop.f32.mrb[1].mxu0 }
 0x1d0   : > { %752 = vmatmul.mubr.msk.f32.vlgmr.msra.gmra.mrb[0].mxu1 %vm449_vm10, %v447_v3 }
 0x2a3   : > { %v523_v7 = vpop.f32.mrb[0].mxu1 }
 0x2a4   : > { %v711_v8 = vmul.f32 -1.442695, %v523_v7  ;;  %v753_v9 = vpop.f32.mrb[1].mxu1 }
 0x2a6   : > { %830 = vpow2.f32 %v711_v8 }
 0x2b0   : > { %v831_v11 = vpop.eup %830 }
 0x2b1   : > { %v530_v12 = vadd.f32 1.0, %v831_v11 }
 0x2b3   : > { %832 = vrcp.f32 %v530_v12 }
 0x2bd   : > { %v833_v16 = vpop.eup %832 }
 0x2be   : > { %v536_v17 = vrot.slane %v833_v16, %v535_v15 }
 0x2c0   : > { %542 = vbcast.lane.b32.xlu1 %v536_v17, 264  ;;  %538 = vbcast.lane.b32.xlu0 %v536_v17, 256 }
 0x2c4   : > { %546 = vbcast.lane.b32.xlu1 %v536_v17, 272  ;;  %554 = vbcast.lane.b32.xlu0 %v536_v17, 288 }
 0x2c8   : > { %550 = vbcast.lane.b32.xlu1 %v536_v17, 280  ;;  %562 = vbcast.lane.b32.xlu0 %v536_v17, 304 }
 0x2cc   : > { %558 = vbcast.lane.b32.xlu1 %v536_v17, 296 }
 0x2d0   : > { %566 = vbcast.lane.b32.xlu1 %v536_v17, 312 }
 0x332   : > { %v543_v18 = vpop.permute.xlu1 %542  ;;  %v539_v21 = vpop.permute.xlu0 %538 }
 0x333   : > { %v570_v22 = vmul.f32 %v543_v18, %v1175_v10  ;;  %v571_v23 = vmul.f32 %v543_v18, %v1180_v13  ;;  %v568_v24 = vmul.f32 %v539_v21, %v1161_v0  ;;  %v569_v14 = vmul.f32 %v539_v21, %v1164_v1 }
 0x335   : > { %586 = vst [vmem:[%s1268_s13 + $0x10] sm:$0xff] %v570_v22  ;;  %587 = vst [vmem:[%s1268_s13 + $0x18] sm:$0xff] %v571_v23 }
 0x336   : > { %584 = vst [vmem:[%s1268_s13] sm:$0xff] %v568_v24  ;;  %585 = vst [vmem:[%s1268_s13 + $0x8] sm:$0xff] %v569_v14  ;;  %v547_v10 = vpop.permute.xlu1 %546  ;;  %v555_v0 = vpop.permute.xlu0 %554 }
 0x337   : > { %v572_v1 = vmul.f32 %v547_v10, %v1168_v5  ;;  %v573_v13 = vmul.f32 %v547_v10, %v1171_v6  ;;  %v576_v27 = vmul.f32 %v555_v0, %v1192_v25  ;;  %v577_v28 = vmul.f32 %v555_v0, %v1195_v26 }
 0x339   : > { %588 = vst [vmem:[%s1268_s13 + $0x20] sm:$0xff] %v572_v1  ;;  %589 = vst [vmem:[%s1268_s13 + $0x28] sm:$0xff] %v573_v13 }
 0x33a   : > { %592 = vst [vmem:[%s1268_s13 + $0x40] sm:$0xff] %v576_v27  ;;  %593 = vst [vmem:[%s1268_s13 + $0x48] sm:$0xff] %v577_v28  ;;  %v551_v29 = vpop.permute.xlu1 %550  ;;  %v563_v30 = vpop.permute.xlu0 %562 }
 0x33b   : > { %v574_v5 = vmul.f32 %v551_v29, %v1185_v19  ;;  %v575_v32 = vmul.f32 %v551_v29, %v1188_v20  ;;  %v580_v6 = vmul.f32 %v563_v30, %v1209_v40  ;;  %v581_v25 = vmul.f32 %v563_v30, %v1212_v41 }
 0x33d   : > { %590 = vst [vmem:[%s1268_s13 + $0x30] sm:$0xff] %v574_v5  ;;  %591 = vst [vmem:[%s1268_s13 + $0x38] sm:$0xff] %v575_v32 }
 0x33e   : > { %596 = vst [vmem:[%s1268_s13 + $0x60] sm:$0xff] %v580_v6  ;;  %597 = vst [vmem:[%s1268_s13 + $0x68] sm:$0xff] %v581_v25  ;;  %v559_v26 = vpop.permute.xlu1 %558 }
 0x33f   : > { %v578_v33 = vmul.f32 %v559_v26, %v1199_v31  ;;  %v579_v35 = vmul.f32 %v559_v26, %v1204_v34 }
 0x341   : > { %594 = vst [vmem:[%s1268_s13 + $0x50] sm:$0xff] %v578_v33  ;;  %595 = vst [vmem:[%s1268_s13 + $0x58] sm:$0xff] %v579_v35 }
 0x342   : > { %v567_v19 = vpop.permute.xlu1 %566 }
 0x343   : > { %v582_v20 = vmul.f32 %v567_v19, %v1215_v44  ;;  %v583_v31 = vmul.f32 %v567_v19, %v1218_v45 }
 0x345   : > { %598 = vst [vmem:[%s1268_s13 + $0x70] sm:$0xff] %v582_v20  ;;  %599 = vst [vmem:[%s1268_s13 + $0x78] sm:$0xff] %v583_v31 }
 0x346   : > { %905 = shalt.err (!%p902_p7)
}
 0x347   : > { %s906_s14 = scalar_lea.hbm %s1299_s6, 2048  ;;  %s910_s21 = scalar_lea.hbm %s1353_s4, 4096 }
 0x348   : > { %p907_p9 = scmp.ne.s32.totalorder %s1299_s6, %s906_s14  ;;  %p911_p5 = scmp.lt.u32.totalorder %s1299_s6, %s1353_s4 }
 0x349   : > { %p912_p11 = scmp.lt.u32.totalorder %s910_s21, %s906_s14  ;;  %p914_p4 = scmp.lt.u32.totalorder %s906_s14, %s1299_s6 }
 0x34a   : > { %p908_p1 = pnand %p907_p9, %p1093_p12 }
 0x34b   : > { %p913_p2 = por %p912_p11, %p911_p5 }
 0x34c   : > { %p909_p0 = pneg %p908_p1 }
 0x34d   : > { %p915_p6 = por %p914_p4, %p913_p2 }
 0x34f   : > { %p916_p8 = pnand %p915_p6, %p909_p0 }
 0x351   : > { %919 = shalt.err (!%p916_p8)
}
 0x352   : > { %s972_s13 = smov 256   ;;  %s973_s20 = smov 16  }
 0x353   : > { %772 = dma.vmem_to_hbm [thread:$0]  (%p1093_p12), %s1301_s9, 2048, %s1299_s6, %s601_s19, %s972_s13, %s972_s13, %s973_s20  }
 0x354 PF: > { %s629_s28 = sand.u32 1, %s950_s15   ;;  %p1368_p10 = scmp.ne.s32.totalorder %s1358_s22, 0 }
 0x355   : > { %p1369_p13 = scmp.ge.s32.totalorder %s962_s18, 2  ;;  %s630_s10 = scalar_lea.sflag [#allocation4], %s629_s28 }
 0x357   : > { %p783_p3 = pnand %p1369_p13, %p1368_p10 }
 0x359   : > { %945 = dma.done.wait (!%p783_p3), %s630_s10, 2048  }
 0x35a   : > { %947 = vsyncadd (!%p783_p3), %s630_s10, 4294965248  ;;  %p18_p7 = scmp.ge.s32.totalorder %s1055_s27, 4   ;;  %s1370_s15 = smov %s954_s16 }
 0x35b   : > { %s1371_s16 = smov %s958_s17  ;;  %s1372_s17 = smov %s1089_s24 }
 0x35c   : > { %s1373_s18 = smov %s1055_s27  ;;  %20 = sbr.rel (!%p18_p7) target bundleno = 6 (0x6), region = 85 }
 0x363   :  { %635 = vsyncpa [#allocation3], 1 }
 0x364   :  { %637 = vsyncpa [#allocation3 + $0x1], 1 }
 0x365   :  { %638 = vsyncpa [#allocation6], 1 }
 0x366   :  { %639 = vsyncpa [#allocation4], 1 }
 0x367   :  { %641 = vsyncpa [#allocation4 + $0x1], 1 }

// kernel: tpu_custom_call.1
= control target key start
LH: loop header
LB: loop body
LE: loop exit
PB: predicated region body
PF: predicated region fallthrough
CT: control target
= control target key end

     0   :  { %9 = vsyncpa [#allocation3], 0  ;;  %s1349_s0 = inlined_call_operand.hbm [shape: f32[2,64,256], index: 0, kind: input, shape index: {}]   ;;  %s1350_s1 = inlined_call_operand.hbm [shape: f32[64,256], index: 1, kind: input, shape index: {}]   ;;  %s1351_s2 = inlined_call_operand.vmem [shape: f32[64,4], index: 2, kind: input, shape index: {}]   ;;  %s1352_s3 = inlined_call_operand.vmem [shape: f32[4,64], index: 3, kind: input, shape index: {}]   ;;  %s1353_s4 = inlined_call_operand.hbm [shape: f32[2,64,256], index: 4, kind: output, shape index: {}]  }
   0x1   :  { %11 = vsyncpa [#allocation3 + $0x1], 0 }
   0x2   :  { %12 = vsyncpa [#allocation6], 0 }
   0x3   :  { %13 = vsyncpa [#allocation4], 0 }
   0x4   :  { %15 = vsyncpa [#allocation4 + $0x1], 0  ;;  %s999_s15 = smov 0   ;;  %s1001_s16 = smov 0  }
   0x5   :  { %s1003_s17 = smov 0   ;;  %s1005_s18 = smov 0  }
   0x6 LB: > { %s1020_s19 = sadd.s32 4294967295, %s962_s18   ;;  %s697_s20 = sadd.s32 4294967294, %s962_s18   ;;  %s962_s18 = sphi %s1005_s18, %s1373_s18   ;;  %s958_s17 = sphi %s1003_s17, %s1372_s17   ;;  %s954_s16 = sphi %s1001_s16, %s1371_s16   ;;  %s950_s15 = sphi %s999_s15, %s1370_s15  }
   0x7   : > { %p41_p0 = scmp.ne.s32.totalorder %s954_s16, %s950_s15  ;;  %p1354_p1 = scmp.eq.s32.totalorder %s1020_s19, 0 }
   0x8   : > { %p134_p3 = scmp.eq.s32.totalorder %s697_s20, 1  ;;  %p698_p5 = scmp.ge.s32.totalorder %s962_s18, 1 }
   0x9   : > { %p1029_p4 = por %p1354_p1, %p41_p0  ;;  %p141_p7 = scmp.lt.s32.totalorder %s962_s18, 3 }
   0xa   : > { %p1034_p6 = por %p134_p3, %p41_p0  ;;  %s964_s24 = smov [#allocation5]  }
   0xb   : > { %s1357_s21 = scalar_select %p1029_p4, 1, 0 }
   0xc   : > { %s1358_s22 = scalar_select %p1034_p6, 1, 0 }
   0xd   : > { %p1039_p8 = pnand %p698_p5, %p141_p7  ;;  %s153_s25 = sshll.u32 %s964_s24, 4  ;;  %s1043_s25 = int_to_ptr.vmem [resolvable:$true] %s153_s25 }
   0xe   : > { %s1055_s27 = sadd.s32 1, %s962_s18   ;;  %s28_s28 = sadd.s32 1, %s958_s17 }
   0xf   : > { %s1359_s23 = scalar_select %p1039_p8, 1, 0 }
  0x10   : > { %p774_p9 = pneg %p1039_p8  ;;  %s25_s29 = ssub.s32 %s962_s18, %s1055_s27 }
  0x11   : > { %s834_s6 = scalar_lea.hbm %s1350_s1, 2048 }
  0x12   : > { %p1050_p11 = pnand %p774_p9, %p1354_p1  ;;  %p835_p12 = scmp.ne.s32.totalorder %s1350_s1, %s834_s6 }
  0x13   : > { %p841_p5 = scmp.lt.u32.totalorder %s834_s6, %s1350_s1 }
  0x14   : > { %p836_p13 = pneg %p1050_p11 }
  0x16   : > { %p837_p0 = pnand %p836_p13, %p835_p12 }
  0x18   : > { %p838_p3 = pneg %p837_p0 }
  0x1a   : > { %p843_p7 = pnand %p841_p5, %p838_p3 }
  0x1c   : > { %846 = shalt.err (!%p843_p7)
}
  0x1d   : > { %s847_s11 = scalar_lea.vmem %s1043_s25, 2048  ;;  %p855_p2 = scmp.lt.s32.totalorder %s1043_s25, %s1043_s25 }
  0x1e   : > { %p848_p9 = scmp.ne.s32.totalorder %s1043_s25, %s847_s11  ;;  %p856_p6 = scmp.lt.s32.totalorder %s847_s11, %s847_s11 }
  0x20   : > { %p850_p10 = pnand %p848_p9, %p836_p13  ;;  %p857_p4 = por %p856_p6, %p855_p2 }
  0x22   : > { %p851_p1 = pneg %p850_p10 }
  0x24   : > { %p858_p8 = pnand %p857_p4, %p851_p1 }
  0x26   : > { %861 = shalt.err (!%p858_p8)
}
  0x27   : > { %s965_s12 = smov 256   ;;  %s966_s13 = smov 16  }
  0x28   : > { %777 = dma.hbm_to_vmem [thread:$0]  (!%p1050_p11), %s1350_s1, 2048, %s1043_s25, [#allocation6], %s965_s12, %s965_s12, %s966_s13  }
  0x29   : > { %p26_p1 = scmp.eq.s32.totalorder %s25_s29, 0  ;;  %p35_p2 = scmp.ne.s32.totalorder %s958_s17, %s954_s16 }
  0x2a   : > { %p36_p4 = scmp.eq.s32.totalorder %s962_s18, 0  ;;  %p787_p6 = scmp.lt.s32.totalorder %s962_s18, 2 }
  0x2b   : > { %s1089_s24 = scalar_select %p26_p1, %s958_s17, %s28_s28  }
  0x2c   : > { %p37_p8 = por %p36_p4, %p35_p2  ;;  %p1361_p10 = scmp.eq.s32.totalorder %s1020_s19, 1 }
  0x2d   : > { %s173_s26 = sand.u32 1, %s958_s17   ;;  %s717_s5 = sshll.u32 %s962_s18, 11 }
  0x2e   : > { %p1093_p12 = por %p1361_p10, %p35_p2  ;;  %s701_s6 = sshll.u32 %s173_s26, 7 }
  0x2f   : > { %s1102_s9 = scalar_lea.hbm %s1349_s0, %s717_s5  ;;  %s177_s25 = scalar_lea.vmem [#allocation2], %s701_s6 }
  0x30   : > { %s184_s28 = sshll.u32 %s177_s25, 4  ;;  %p1104_p11 = pnand %p787_p6, %p37_p8  ;;  %s1108_s28 = int_to_ptr.vmem [resolvable:$true] %s184_s28 }
  0x31   : > { %s1110_s10 = scalar_lea.sflag [#allocation3], %s173_s26  ;;  %s862_s11 = scalar_lea.hbm %s1102_s9, 2048 }
  0x32   : > { %p863_p13 = scmp.ne.s32.totalorder %s1102_s9, %s862_s11  ;;  %p864_p0 = pneg %p1104_p11 }
  0x33   : > { %s867_s5 = scalar_lea.hbm %s1349_s0, 4096  ;;  %p868_p7 = scmp.lt.u32.totalorder %s1102_s9, %s1349_s0 }
  0x34   : > { %p865_p3 = pnand %p864_p0, %p863_p13  ;;  %p869_p9 = scmp.lt.u32.totalorder %s867_s5, %s862_s11 }
  0x35   : > { %p871_p2 = scmp.lt.u32.totalorder %s862_s11, %s1102_s9 }
  0x36   : > { %p866_p5 = pneg %p865_p3  ;;  %p870_p1 = por %p869_p9, %p868_p7 }
  0x38   : > { %p872_p4 = por %p871_p2, %p870_p1 }
  0x3a   : > { %p873_p6 = pnand %p872_p4, %p866_p5 }
  0x3c   : > { %876 = shalt.err (!%p873_p6)
}
  0x3d   : > { %s877_s26 = scalar_lea.vmem %s1108_s28, 2048  ;;  %s967_s8 = smov [#allocation2]  }
  0x3e   : > { %p878_p8 = scmp.ne.s32.totalorder %s1108_s28, %s877_s26  ;;  %s882_s25 = sshll.u32 %s967_s8, 4  ;;  %s883_s25 = int_to_ptr.vmem [resolvable:$false] %s882_s25 }
  0x3f   : > { %s884_s14 = scalar_lea.vmem %s883_s25, 4096  ;;  %p885_p3 = scmp.lt.s32.totalorder %s1108_s28, %s883_s25 }
  0x40   : > { %p880_p10 = pnand %p878_p8, %p864_p0  ;;  %p886_p7 = scmp.lt.s32.totalorder %s884_s14, %s877_s26 }
  0x42   : > { %p881_p13 = pneg %p880_p10  ;;  %p887_p9 = por %p886_p7, %p885_p3 }
  0x44   : > { %p888_p1 = pnand %p887_p9, %p881_p13 }
  0x46   : > { %891 = shalt.err (!%p888_p1)
}
  0x47   : > { %781 = dma.hbm_to_vmem [thread:$0]  (!%p1104_p11), %s1102_s9, 2048, %s1108_s28, %s1110_s10, %s965_s12, %s965_s12, %s966_s13  }
  0x48   : > { %p1364_p0 = scmp.ne.s32.totalorder %s1359_s23, 0 }
  0x49   : > { %s1144_s11 = sand.u32 (!%p1364_p0), 1, %s954_s16   ;;  %p1365_p5 = scmp.ne.s32.totalorder (!%p1364_p0), %s1357_s21, 0 }
  0x4a   : > { %196 = sbr.rel (%p1364_p0) target bundleno = 852 (0x354), region = 36  ;;  %s705_s20 = sshll.u32 (!%p1364_p0), %s1144_s11, 7 }
  0x4b   : > { %s199_s5 = scalar_lea.sflag (!%p1364_p0), [#allocation3], %s1144_s11  ;;  %s1150_s29 = scalar_lea.vmem (!%p1364_p0), [#allocation2], %s705_s20 }
  0x51   : > { %937 = dma.done.wait (%p1365_p5), %s199_s5, 2048  }
  0x52   : > { %939 = vsyncadd (%p1365_p5), %s199_s5, 4294965248  ;;  %p1366_p11 = scmp.eq.s32.totalorder %s1020_s19, 0 }
  0x54   : > { %941 = dma.done.wait (%p1366_p11), [#allocation6], 2048   ;;  %p1367_p2 = pmov %p1366_p11 }
  0x55   : > { %v1161_v0 = vld [vmem:[%s1150_s29] sm:$0xff]  ;;  %v1164_v1 = vld [vmem:[%s1150_s29 + $0x8] sm:$0xff]  ;;  %v1175_v10 = vld [vmem:[%s1150_s29 + $0x10] sm:$0xff]  ;;  %v968_v59 = vmov 0.0|0.0   ;;  %vm969_vm0 = vmmov 0   ;;  %vm330_vm1 = vcmask 130112  }
  0x56   : > { %943 = vsyncadd (%p1367_p2), [#allocation6], 4294965248  ;;  %v247_v2 = vld [vmem:[#allocation5] sm:$0xff]  ;;  %v248_v3 = vld [vmem:[#allocation5 + $0x8] sm:$0xff]  ;;  %754 = vmatprep.subr.bf16.mxu0 %v968_v59  ;;  %vm337_vm2 = vcmask 195712   ;;  %vm344_vm3 = vcmask 261312  }
  0x57   : > { %v263_v4 = vmul.f32 %v247_v2, %v1161_v0  ;;  %v1168_v5 = vld [vmem:[%s1150_s29 + $0x20] sm:$0xff]  ;;  %v1171_v6 = vld [vmem:[%s1150_s29 + $0x28] sm:$0xff]  ;;  %v264_v7 = vmul.f32 %v248_v3, %v1164_v1  ;;  %v1180_v13 = vld [vmem:[%s1150_s29 + $0x18] sm:$0xff]  ;;  %vm351_vm4 = vcmask 326912   ;;  %vm358_vm5 = vcmask 392512   ;;  %s1268_s13 = scalar_lea.vmem [#allocation7], %s705_s20 }
  0x58   : > { %v251_v8 = vld [vmem:[#allocation5 + $0x20] sm:$0xff]  ;;  %v252_v9 = vld [vmem:[#allocation5 + $0x28] sm:$0xff]  ;;  %v249_v14 = vld [vmem:[#allocation5 + $0x10] sm:$0xff]  ;;  %vm365_vm6 = vcmask 458112   ;;  %vm372_vm7 = vcmask 523712   ;;  %vm374_vm8 = vcmask 523264  }
  0x59   : > { %v267_v11 = vmul.f32 %v251_v8, %v1168_v5  ;;  %v268_v12 = vmul.f32 %v252_v9, %v1171_v6  ;;  %v250_v15 = vld [vmem:[#allocation5 + $0x18] sm:$0xff]  ;;  %v279_v16 = vadd.f32 %v264_v7, %v263_v4  ;;  %v265_v17 = vmul.f32 %v249_v14, %v1175_v10  ;;  %v1185_v19 = vld [vmem:[%s1150_s29 + $0x30] sm:$0xff]  ;;  %v1192_v25 = vld [vmem:[%s1150_s29 + $0x40] sm:$0xff]  ;;  %s718_s20 = sshll.u32 %s1020_s19, 11  ;;  %s614_s9 = sshll.u32 %s1268_s13, 4  ;;  %s1301_s9 = int_to_ptr.vmem [resolvable:$true] %s614_s9 }
  0x5a   : > { %v266_v18 = vmul.f32 %v250_v15, %v1180_v13  ;;  %v1188_v20 = vld [vmem:[%s1150_s29 + $0x38] sm:$0xff]  ;;  %v253_v21 = vld [vmem:[#allocation5 + $0x30] sm:$0xff]  ;;  %v1195_v26 = vld [vmem:[%s1150_s29 + $0x48] sm:$0xff]  ;;  %v970_v9 = vmov 0.0   ;;  %vm453_vm9 = vcmask 1043456   ;;  %vm449_vm10 = vcmask 31744   ;;  %s1299_s6 = scalar_lea.hbm %s1353_s4, %s718_s20 }
  0x5b   : > { %v285_v22 = vadd.f32 %v268_v12, %v267_v11  ;;  %v254_v23 = vld [vmem:[#allocation5 + $0x38] sm:$0xff]  ;;  %v269_v24 = vmul.f32 %v253_v21, %v1185_v19  ;;  %280 = vadd.xlane.f32.xlu0 %v279_v16  ;;  %v255_v29 = vld [vmem:[#allocation5 + $0x40] sm:$0xff]  ;;  %v256_v30 = vld [vmem:[#allocation5 + $0x48] sm:$0xff]  ;;  %746 = vmatprep.mubr.msk.f32.mxu0 %vm969_vm0, %v970_v9  ;;  %v319_v11 = vlaneseq  ;;  %s601_s19 = scalar_lea.sflag [#allocation4], %s1144_s11  ;;  %s892_s7 = scalar_lea.vmem %s1301_s9, 2048 }
  0x5c   : > { %v282_v27 = vadd.f32 %v266_v18, %v265_v17  ;;  %v270_v28 = vmul.f32 %v254_v23, %v1188_v20  ;;  %v1199_v31 = vld [vmem:[%s1150_s29 + $0x50] sm:$0xff]  ;;  %v271_v32 = vmul.f32 %v255_v29, %v1192_v25  ;;  %v272_v33 = vmul.f32 %v256_v30, %v1195_v26  ;;  %v1204_v34 = vld [vmem:[%s1150_s29 + $0x58] sm:$0xff]  ;;  %v1209_v40 = vld [vmem:[%s1150_s29 + $0x60] sm:$0xff]  ;;  %749 = vmatprep.subr.mxu1 %v970_v9  ;;  %p893_p4 = scmp.ne.s32.totalorder %s1301_s9, %s892_s7  ;;  %s971_s26 = smov [#allocation7]  }
  0x5d   : > { %286 = vadd.xlane.f32.xlu1 %v285_v22  ;;  %v257_v35 = vld [vmem:[#allocation5 + $0x50] sm:$0xff]  ;;  %v258_v36 = vld [vmem:[#allocation5 + $0x58] sm:$0xff]  ;;  %v1212_v41 = vld [vmem:[%s1150_s29 + $0x68] sm:$0xff]  ;;  %751 = vmatprep.mubr.msk.f32.mxu1 %vm969_vm0, %v970_v9  ;;  %v320_v12 = vand.u32 127, %v319_v11  ;;  %v1248_v14 = vshrl.u32 %v319_v11, 7  ;;  %s896_s8 = sshll.u32 %s971_s26, 4  ;;  %s897_s8 = int_to_ptr.vmem [resolvable:$false] %s896_s8 }
  0x5e   : > { %v288_v37 = vadd.f32 %v270_v28, %v269_v24  ;;  %v273_v38 = vmul.f32 %v257_v35, %v1199_v31  ;;  %v274_v39 = vmul.f32 %v258_v36, %v1204_v34  ;;  %v259_v42 = vld [vmem:[#allocation5 + $0x60] sm:$0xff]  ;;  %v260_v43 = vld [vmem:[#allocation5 + $0x68] sm:$0xff]  ;;  %v1215_v44 = vld [vmem:[%s1150_s29 + $0x70] sm:$0xff]  ;;  %v291_v46 = vadd.f32 %v272_v33, %v271_v32  ;;  %p894_p6 = pnand %p893_p4, %p1093_p12  ;;  %s898_s25 = scalar_lea.vmem %s897_s8, 4096 }
  0x5f   : > { %v1218_v45 = vld [vmem:[%s1150_s29 + $0x78] sm:$0xff]  ;;  %283 = vadd.xlane.f32.xlu0 %v282_v27  ;;  %v275_v47 = vmul.f32 %v259_v42, %v1209_v40  ;;  %v276_v48 = vmul.f32 %v260_v43, %v1212_v41  ;;  %v261_v49 = vld [vmem:[#allocation5 + $0x70] sm:$0xff]  ;;  %v303_v56 = vld [vmem:[%s1351_s2] sm:$0xff]  ;;  %v325_v15 = vadd.s32 4294967288, %v320_v12  ;;  %v332_v16 = vadd.s32 4294967280, %v320_v12  ;;  %p899_p10 = scmp.lt.s32.totalorder %s1301_s9, %s897_s8  ;;  %p900_p13 = scmp.lt.s32.totalorder %s898_s25, %s892_s7 }
  0x60   : > { %v262_v50 = vld [vmem:[#allocation5 + $0x78] sm:$0xff]  ;;  %v294_v51 = vadd.f32 %v274_v39, %v273_v38  ;;  %v277_v52 = vmul.f32 %v261_v49, %v1215_v44  ;;  %v304_v57 = vld [vmem:[%s1351_s2 + $0x8] sm:$0xff]  ;;  %v305_v60 = vld [vmem:[%s1351_s2 + $0x10] sm:$0xff]  ;;  %v339_v17 = vadd.s32 4294967272, %v320_v12  ;;  %v323_v21 = vsub.s32 %v320_v12, %v1248_v14  ;;  %p895_p8 = pneg %p894_p6 }
  0x61   : > { %289 = vadd.xlane.f32.xlu1 %v288_v37  ;;  %v278_v53 = vmul.f32 %v262_v50, %v1218_v45  ;;  %v297_v54 = vadd.f32 %v276_v48, %v275_v47  ;;  %v755_v58 = vpack.c.bf16 %v304_v57, %v303_v56  ;;  %v306_v61 = vld [vmem:[%s1351_s2 + $0x18] sm:$0xff]  ;;  %v307_v63 = vld [vmem:[%s1351_s2 + $0x20] sm:$0xff]  ;;  %v308_v2 = vld [vmem:[%s1351_s2 + $0x28] sm:$0xff]  ;;  %v328_v23 = vsub.s32 %v325_v15, %v1248_v14  ;;  %p901_p3 = por %p900_p13, %p899_p10 }
  0x62   : > { %v758_v62 = vpack.c.bf16 %v306_v61, %v305_v60  ;;  %v761_v3 = vpack.c.bf16 %v308_v2, %v307_v63  ;;  %v309_v4 = vld [vmem:[%s1351_s2 + $0x30] sm:$0xff]  ;;  %v310_v7 = vld [vmem:[%s1351_s2 + $0x38] sm:$0xff]  ;;  %v346_v24 = vadd.s32 4294967264, %v320_v12  ;;  %v335_v27 = vsub.s32 %v332_v16, %v1248_v14  ;;  %v448_v63 = vld [vmem:[%s1352_s3] sm:$0xf] }
  0x63   : > { %292 = vadd.xlane.f32.xlu0 %v291_v46  ;;  %v300_v55 = vadd.f32 %v278_v53, %v277_v52  ;;  %756 = vmatpush3.bf16.msra.mxu0 %v755_v58  ;;  %v764_v8 = vpack.c.bf16 %v310_v7, %v309_v4  ;;  %v342_v28 = vsub.s32 %v339_v17, %v1248_v14  ;;  %v353_v29 = vadd.s32 4294967256, %v320_v12  ;;  %p902_p7 = pnand %p901_p3, %p895_p8 }
  0x64   : > { %757 = vmatprep.subr.bf16.mxu0 %v968_v59  ;;  %v349_v36 = vsub.s32 %v346_v24, %v1248_v14  ;;  %v360_v37 = vadd.s32 4294967248, %v320_v12  ;;  %v367_v43 = vadd.s32 4294967240, %v320_v12  ;;  %750 = vmatpush3.msk.msra.mxu1 %vm453_vm9, %v448_v63  ;;  %v535_v15 = vsub.s32 0, %v1248_v14 }
  0x65   : > { %295 = vadd.xlane.f32.xlu1 %v294_v51  ;;  %v356_v42 = vsub.s32 %v353_v29, %v1248_v14 }
  0x66   : > { %v363_v52 = vsub.s32 %v360_v37, %v1248_v14 }
  0x67   : > { %298 = vadd.xlane.f32.xlu0 %v297_v54  ;;  %759 = vmatpush3.bf16.msra.mxu0 %v758_v62  ;;  %v370_v54 = vsub.s32 %v367_v43, %v1248_v14 }
  0x68   : > { %760 = vmatprep.subr.bf16.mxu0 %v968_v59 }
  0x69   : > { %301 = vadd.xlane.f32.xlu1 %v300_v55 }
  0x6b   : > { %762 = vmatpush3.bf16.msra.mxu0 %v761_v3 }
  0x6c   : > { %763 = vmatprep.subr.bf16.mxu0 %v968_v59 }
  0x6f   : > { %765 = vmatpush3.bf16.msra.mxu0 %v764_v8 }
  0xe8   : > { %v281_v18 = vpop.xlane.xlu0 %280 }
  0xe9   : > { %v324_v32 = vrot.slane %v281_v18, %v323_v21 }
  0xea   : > { %v287_v22 = vpop.xlane.xlu1 %286 }
  0xeb   : > { %v336_v38 = vrot.slane %v287_v22, %v335_v27 }
  0xec   : > { %v284_v30 = vpop.xlane.xlu0 %283 }
  0xed   : > { %v329_v33 = vrot.slane %v284_v30, %v328_v23 }
  0xee   : > { %v290_v35 = vpop.xlane.xlu1 %289 }
  0xef   : > { %v343_v39 = vrot.slane %v290_v35, %v342_v28  ;;  %v331_v46 = vsel %vm330_vm1, %v329_v33, %v324_v32 }
  0xf0   : > { %v338_v47 = vsel %vm337_vm2, %v336_v38, %v331_v46  ;;  %v293_v48 = vpop.xlane.xlu0 %292 }
  0xf1   : > { %v345_v49 = vsel %vm344_vm3, %v343_v39, %v338_v47  ;;  %v350_v50 = vrot.slane %v293_v48, %v349_v36 }
  0xf2   : > { %v296_v51 = vpop.xlane.xlu1 %295 }
  0xf3   : > { %v357_v53 = vrot.slane %v296_v51, %v356_v42  ;;  %v352_v55 = vsel %vm351_vm4, %v350_v50, %v345_v49 }
  0xf4   : > { %v299_v56 = vpop.xlane.xlu0 %298 }
  0xf5   : > { %v364_v57 = vrot.slane %v299_v56, %v363_v52  ;;  %v359_v59 = vsel %vm358_vm5, %v357_v53, %v352_v55 }
  0xf6   : > { %v302_v58 = vpop.xlane.xlu1 %301 }
  0xf7   : > { %v371_v60 = vrot.slane %v302_v58, %v370_v54  ;;  %v366_v61 = vsel %vm365_vm6, %v364_v57, %v359_v59 }
  0xf9   : > { %v373_v62 = vsel %vm372_vm7, %v371_v60, %v366_v61 }
  0xfa   : > { %747 = vmatmul.mubr.msk.f32.vlgmr.msra.gmra.mrb[0].mxu0 %vm374_vm8, %v373_v62 }
 0x1cd   : > { %v443_v2 = vpop.f32.mrb[0].mxu0 }
 0x1ce   : > { %v447_v3 = vmax.f32 %v443_v2, 0.0  ;;  %v748_v4 = vpop.f32.mrb[1].mxu0 }
 0x1d0   : > { %752 = vmatmul.mubr.msk.f32.vlgmr.msra.gmra.mrb[0].mxu1 %vm449_vm10, %v447_v3 }
 0x2a3   : > { %v523_v7 = vpop.f32.mrb[0].mxu1 }
 0x2a4   : > { %v711_v8 = vmul.f32 -1.442695, %v523_v7  ;;  %v753_v9 = vpop.f32.mrb[1].mxu1 }
 0x2a6   : > { %830 = vpow2.f32 %v711_v8 }
 0x2b0   : > { %v831_v11 = vpop.eup %830 }
 0x2b1   : > { %v530_v12 = vadd.f32 1.0, %v831_v11 }
 0x2b3   : > { %832 = vrcp.f32 %v530_v12 }
 0x2bd   : > { %v833_v16 = vpop.eup %832 }
 0x2be   : > { %v536_v17 = vrot.slane %v833_v16, %v535_v15 }
 0x2c0   : > { %542 = vbcast.lane.b32.xlu1 %v536_v17, 264  ;;  %538 = vbcast.lane.b32.xlu0 %v536_v17, 256 }
 0x2c4   : > { %546 = vbcast.lane.b32.xlu1 %v536_v17, 272  ;;  %554 = vbcast.lane.b32.xlu0 %v536_v17, 288 }
 0x2c8   : > { %550 = vbcast.lane.b32.xlu1 %v536_v17, 280  ;;  %562 = vbcast.lane.b32.xlu0 %v536_v17, 304 }
 0x2cc   : > { %558 = vbcast.lane.b32.xlu1 %v536_v17, 296 }
 0x2d0   : > { %566 = vbcast.lane.b32.xlu1 %v536_v17, 312 }
 0x332   : > { %v543_v18 = vpop.permute.xlu1 %542  ;;  %v539_v21 = vpop.permute.xlu0 %538 }
 0x333   : > { %v570_v22 = vmul.f32 %v543_v18, %v1175_v10  ;;  %v571_v23 = vmul.f32 %v543_v18, %v1180_v13  ;;  %v568_v24 = vmul.f32 %v539_v21, %v1161_v0  ;;  %v569_v14 = vmul.f32 %v539_v21, %v1164_v1 }
 0x335   : > { %586 = vst [vmem:[%s1268_s13 + $0x10] sm:$0xff] %v570_v22  ;;  %587 = vst [vmem:[%s1268_s13 + $0x18] sm:$0xff] %v571_v23 }
 0x336   : > { %584 = vst [vmem:[%s1268_s13] sm:$0xff] %v568_v24  ;;  %585 = vst [vmem:[%s1268_s13 + $0x8] sm:$0xff] %v569_v14  ;;  %v547_v10 = vpop.permute.xlu1 %546  ;;  %v555_v0 = vpop.permute.xlu0 %554 }
 0x337   : > { %v572_v1 = vmul.f32 %v547_v10, %v1168_v5  ;;  %v573_v13 = vmul.f32 %v547_v10, %v1171_v6  ;;  %v576_v27 = vmul.f32 %v555_v0, %v1192_v25  ;;  %v577_v28 = vmul.f32 %v555_v0, %v1195_v26 }
 0x339   : > { %588 = vst [vmem:[%s1268_s13 + $0x20] sm:$0xff] %v572_v1  ;;  %589 = vst [vmem:[%s1268_s13 + $0x28] sm:$0xff] %v573_v13 }
 0x33a   : > { %592 = vst [vmem:[%s1268_s13 + $0x40] sm:$0xff] %v576_v27  ;;  %593 = vst [vmem:[%s1268_s13 + $0x48] sm:$0xff] %v577_v28  ;;  %v551_v29 = vpop.permute.xlu1 %550  ;;  %v563_v30 = vpop.permute.xlu0 %562 }
 0x33b   : > { %v574_v5 = vmul.f32 %v551_v29, %v1185_v19  ;;  %v575_v32 = vmul.f32 %v551_v29, %v1188_v20  ;;  %v580_v6 = vmul.f32 %v563_v30, %v1209_v40  ;;  %v581_v25 = vmul.f32 %v563_v30, %v1212_v41 }
 0x33d   : > { %590 = vst [vmem:[%s1268_s13 + $0x30] sm:$0xff] %v574_v5  ;;  %591 = vst [vmem:[%s1268_s13 + $0x38] sm:$0xff] %v575_v32 }
 0x33e   : > { %596 = vst [vmem:[%s1268_s13 + $0x60] sm:$0xff] %v580_v6  ;;  %597 = vst [vmem:[%s1268_s13 + $0x68] sm:$0xff] %v581_v25  ;;  %v559_v26 = vpop.permute.xlu1 %558 }
 0x33f   : > { %v578_v33 = vmul.f32 %v559_v26, %v1199_v31  ;;  %v579_v35 = vmul.f32 %v559_v26, %v1204_v34 }
 0x341   : > { %594 = vst [vmem:[%s1268_s13 + $0x50] sm:$0xff] %v578_v33  ;;  %595 = vst [vmem:[%s1268_s13 + $0x58] sm:$0xff] %v579_v35 }
 0x342   : > { %v567_v19 = vpop.permute.xlu1 %566 }
 0x343   : > { %v582_v20 = vmul.f32 %v567_v19, %v1215_v44  ;;  %v583_v31 = vmul.f32 %v567_v19, %v1218_v45 }
 0x345   : > { %598 = vst [vmem:[%s1268_s13 + $0x70] sm:$0xff] %v582_v20  ;;  %599 = vst [vmem:[%s1268_s13 + $0x78] sm:$0xff] %v583_v31 }
 0x346   : > { %905 = shalt.err (!%p902_p7)
}
 0x347   : > { %s906_s14 = scalar_lea.hbm %s1299_s6, 2048  ;;  %s910_s21 = scalar_lea.hbm %s1353_s4, 4096 }
 0x348   : > { %p907_p9 = scmp.ne.s32.totalorder %s1299_s6, %s906_s14  ;;  %p911_p5 = scmp.lt.u32.totalorder %s1299_s6, %s1353_s4 }
 0x349   : > { %p912_p11 = scmp.lt.u32.totalorder %s910_s21, %s906_s14  ;;  %p914_p4 = scmp.lt.u32.totalorder %s906_s14, %s1299_s6 }
 0x34a   : > { %p908_p1 = pnand %p907_p9, %p1093_p12 }
 0x34b   : > { %p913_p2 = por %p912_p11, %p911_p5 }
 0x34c   : > { %p909_p0 = pneg %p908_p1 }
 0x34d   : > { %p915_p6 = por %p914_p4, %p913_p2 }
 0x34f   : > { %p916_p8 = pnand %p915_p6, %p909_p0 }
 0x351   : > { %919 = shalt.err (!%p916_p8)
}
 0x352   : > { %s972_s13 = smov 256   ;;  %s973_s20 = smov 16  }
 0x353   : > { %772 = dma.vmem_to_hbm [thread:$0]  (%p1093_p12), %s1301_s9, 2048, %s1299_s6, %s601_s19, %s972_s13, %s972_s13, %s973_s20  }
 0x354 PF: > { %s629_s28 = sand.u32 1, %s950_s15   ;;  %p1368_p10 = scmp.ne.s32.totalorder %s1358_s22, 0 }
 0x355   : > { %p1369_p13 = scmp.ge.s32.totalorder %s962_s18, 2  ;;  %s630_s10 = scalar_lea.sflag [#allocation4], %s629_s28 }
 0x357   : > { %p783_p3 = pnand %p1369_p13, %p1368_p10 }
 0x359   : > { %945 = dma.done.wait (!%p783_p3), %s630_s10, 2048  }
 0x35a   : > { %947 = vsyncadd (!%p783_p3), %s630_s10, 4294965248  ;;  %p18_p7 = scmp.ge.s32.totalorder %s1055_s27, 4   ;;  %s1370_s15 = smov %s954_s16 }
 0x35b   : > { %s1371_s16 = smov %s958_s17  ;;  %s1372_s17 = smov %s1089_s24 }
 0x35c   : > { %s1373_s18 = smov %s1055_s27  ;;  %20 = sbr.rel (!%p18_p7) target bundleno = 6 (0x6), region = 85 }
 0x363   :  { %635 = vsyncpa [#allocation3], 1 }
 0x364   :  { %637 = vsyncpa [#allocation3 + $0x1], 1 }
 0x365   :  { %638 = vsyncpa [#allocation6], 1 }
 0x366   :  { %639 = vsyncpa [#allocation4], 1 }
 0x367   :  { %641 = vsyncpa [#allocation4 + $0x1], 1 }

</bundles_post_ra>
